<compile_context>
chip_gen: v5e
topology: v5e:2x2
jax: 0.10.0
libtpu: 0.0.40
codegen_flags: <defaults>
</compile_context>

<pallas_src>
import functools

import jax
import jax.numpy as jnp
import numpy as np
from jax.experimental import pallas as pl
from jax.experimental.pallas import tpu as pltpu

LANES = 128
SUBLANES = 8


def _round_up(x, m):
    return (x + m - 1) // m * m


def _accuracy_kernel(inv_n_depth, thr_ref, pred_ref, targ_ref, out_ref):
    # Hoist the three SMEM threshold reads once per kernel invocation.
    t0 = thr_ref[0]
    t1 = thr_ref[1]
    t2 = thr_ref[2]

    pred = pred_ref[...]            # (TR, 128) f32 tile
    targ = targ_ref[...]

    r1 = pred / targ                # predicted / target
    r2 = targ / pred                # target / predicted

    # torch.nan_to_num(..., posinf=True):  nan -> 0.0, +inf -> 1.0,
    # -inf -> most-negative finite float32.
    fmin = jnp.float32(jnp.finfo(jnp.float32).min)
    r2 = jnp.where(jnp.isnan(r2), jnp.float32(0.0), r2)
    r2 = jnp.where(r2 == jnp.inf, jnp.float32(1.0), r2)
    r2 = jnp.where(r2 == -jnp.inf, fmin, r2)

    # torch.max(a, b) is NaN-propagating elementwise max, as is jnp.maximum.
    max_rel = jnp.maximum(r1, r2)

    # (max_rel < thresholds).float().sum(dim=1): per-element count of
    # satisfied thresholds (NaN compares False, matching torch).
    count = ((max_rel < t0).astype(jnp.float32)
             + (max_rel < t1).astype(jnp.float32)
             + (max_rel < t2).astype(jnp.float32))

    # Constant-reciprocal multiply (folded in Python) instead of an f32 divide.
    out_ref[...] = count * jnp.float32(inv_n_depth)


def accuracy(predicted, target, thresholds, *, tile_rows=512):
    """predicted, target: (n_depth, 1) float32; thresholds: (3,) float32."""
    n_depth, k = predicted.shape
    assert k == 1

    # Flatten the depth axis and pad it so it reshapes into a whole number of
    # (tr, 128) tiles whose sublane dim is a multiple of 8 (full f32 vregs).
    rows_raw = pl.cdiv(n_depth, LANES)
    tr = min(tile_rows, _round_up(rows_raw, SUBLANES))
    rows = _round_up(rows_raw, tr)
    n_padded = rows * LANES
    pad = n_padded - n_depth

    # Pad with 1.0 so padded lanes stay finite; they are sliced off below.
    p_flat = jnp.pad(predicted.reshape(n_depth), (0, pad), constant_values=1.0)
    t_flat = jnp.pad(target.reshape(n_depth), (0, pad), constant_values=1.0)
    p2 = p_flat.reshape(rows, LANES)
    t2 = t_flat.reshape(rows, LANES)

    out = pl.pallas_call(
        functools.partial(_accuracy_kernel, 1.0 / n_depth),
        out_shape=jax.ShapeDtypeStruct((rows, LANES), jnp.float32),
        grid=(rows // tr,),
        in_specs=[
            pl.BlockSpec(memory_space=pltpu.MemorySpace.SMEM),   # thresholds
            pl.BlockSpec((tr, LANES), lambda i: (i, 0)),         # predicted
            pl.BlockSpec((tr, LANES), lambda i: (i, 0)),         # target
        ],
        out_specs=pl.BlockSpec((tr, LANES), lambda i: (i, 0)),
        compiler_params=pltpu.CompilerParams(
            dimension_semantics=("parallel",)),
        cost_estimate=pl.CostEstimate(
            flops=10 * n_padded,
            transcendentals=2 * n_padded,
            bytes_accessed=12 * n_padded),
    )(thresholds, p2, t2)

    # Padded lanes hold garbage-but-finite values; slice back to exactly n_depth.
    return out.reshape(n_padded)[:n_depth]


def _reference(predicted, target, thresholds):
    """Pure-JAX replica of the PyTorch forward, for verification."""
    n_depth = predicted.shape[0]
    r1 = predicted / target
    r2 = target / predicted
    fmin = jnp.finfo(jnp.float32).min
    r2 = jnp.where(jnp.isnan(r2), 0.0, r2)
    r2 = jnp.where(r2 == jnp.inf, 1.0, r2)
    r2 = jnp.where(r2 == -jnp.inf, fmin, r2)
    max_rel = jnp.maximum(r1, r2)                               # (n_depth, 1)
    cmp = (max_rel < thresholds[None, :]).astype(jnp.float32)   # (n_depth, 3)
    return jnp.sum(cmp, axis=1) / n_depth


if __name__ == "__main__":
    n_depth = 256
    key = jax.random.PRNGKey(0)
    kp, kt = jax.random.split(key)
    predicted = jax.random.uniform(kp, (n_depth, 1), jnp.float32, 0.1, 10.0)
    target = predicted * jax.random.uniform(kt, (n_depth, 1), jnp.float32, 0.6, 1.8)
    # exercise all nan_to_num paths:
    predicted = predicted.at[3, 0].set(0.0)    # target/pred -> +inf -> 1.0
    target = target.at[7, 0].set(0.0)          # pred/target -> +inf (kept)
    predicted = predicted.at[11, 0].set(0.0)   # 0/0 -> NaN -> 0.0
    target = target.at[11, 0].set(0.0)
    predicted = predicted.at[15, 0].set(0.0)   # neg/0 -> -inf -> fmin
    target = target.at[15, 0].set(-5.0)

    # deterministic "parameter": thresholds from the module __init__
    thresholds = jnp.asarray([1.25, 1.25 ** 2, 1.25 ** 3], dtype=jnp.float32)

    out = jax.block_until_ready(accuracy(predicted, target, thresholds))
    ref = _reference(predicted, target, thresholds)

    np.testing.assert_allclose(np.asarray(out), np.asarray(ref),
                               rtol=1e-6, atol=1e-6)
    print("KERNEL_OK")
</pallas_src>

<mosaic_0001>
module attributes {stable_mosaic.version = 11 : i64} {
  func.func @_accuracy_kernel(%arg0: i32, %arg1: memref<3xf32, #tpu.memory_space<smem>>, %arg2: memref<8x128xf32, #tpu.memory_space<vmem>>, %arg3: memref<8x128xf32, #tpu.memory_space<vmem>>, %arg4: memref<8x128xf32, #tpu.memory_space<vmem>>) attributes {dimension_semantics = [#tpu.dimension_semantics<parallel>], iteration_bounds = array<i64: 1>, scalar_prefetch = 0 : i64, scratch_operands = 0 : i64, tpu.core_type = #tpu.core_type<tc>, window_params = [{transform_indices = @transform_0, window_bounds = array<i64: 3>}, {transform_indices = @transform_1, window_bounds = array<i64: 8, 128>}, {transform_indices = @transform_2, window_bounds = array<i64: 8, 128>}, {transform_indices = @transform_3, window_bounds = array<i64: 8, 128>}]} {
    %c0 = arith.constant 0 : index
    %0 = memref.load %arg1[%c0] : memref<3xf32, #tpu.memory_space<smem>>
    %c1 = arith.constant 1 : index
    %1 = memref.load %arg1[%c1] : memref<3xf32, #tpu.memory_space<smem>>
    %c2 = arith.constant 2 : index
    %2 = memref.load %arg1[%c2] : memref<3xf32, #tpu.memory_space<smem>>
    %c0_0 = arith.constant 0 : index
    %c0_1 = arith.constant 0 : index
    %3 = vector.load %arg2[%c0_0, %c0_1] : memref<8x128xf32, #tpu.memory_space<vmem>>, vector<8x128xf32>
    %c0_2 = arith.constant 0 : index
    %c0_3 = arith.constant 0 : index
    %4 = vector.load %arg3[%c0_2, %c0_3] : memref<8x128xf32, #tpu.memory_space<vmem>>, vector<8x128xf32>
    %5 = arith.divf %3, %4 : vector<8x128xf32>
    %6 = arith.divf %4, %3 : vector<8x128xf32>
    %7 = arith.cmpf one, %6, %6 : vector<8x128xf32>
    %cst = arith.constant 0.000000e+00 : f32
    %8 = vector.broadcast %cst : f32 to vector<8x128xf32>
    %9 = arith.select %7, %8, %6 : vector<8x128xi1>, vector<8x128xf32>
    %cst_4 = arith.constant 0x7F800000 : f32
    %10 = vector.broadcast %cst_4 : f32 to vector<8x128xf32>
    %11 = arith.cmpf oeq, %9, %10 : vector<8x128xf32>
    %cst_5 = arith.constant 1.000000e+00 : f32
    %12 = vector.broadcast %cst_5 : f32 to vector<8x128xf32>
    %13 = arith.select %11, %12, %9 : vector<8x128xi1>, vector<8x128xf32>
    %cst_6 = arith.constant 0xFF800000 : f32
    %14 = vector.broadcast %cst_6 : f32 to vector<8x128xf32>
    %15 = arith.cmpf oeq, %13, %14 : vector<8x128xf32>
    %cst_7 = arith.constant -3.40282347E+38 : f32
    %16 = vector.broadcast %cst_7 : f32 to vector<8x128xf32>
    %17 = arith.select %15, %16, %13 : vector<8x128xi1>, vector<8x128xf32>
    %18 = arith.maximumf %5, %17 : vector<8x128xf32>
    %19 = vector.broadcast %0 : f32 to vector<8x128xf32>
    %20 = arith.cmpf olt, %18, %19 : vector<8x128xf32>
    %21 = arith.extui %20 : vector<8x128xi1> to vector<8x128xi32>
    %22 = arith.sitofp %21 : vector<8x128xi32> to vector<8x128xf32>
    %23 = vector.broadcast %1 : f32 to vector<8x128xf32>
    %24 = arith.cmpf olt, %18, %23 : vector<8x128xf32>
    %25 = arith.extui %24 : vector<8x128xi1> to vector<8x128xi32>
    %26 = arith.sitofp %25 : vector<8x128xi32> to vector<8x128xf32>
    %27 = arith.addf %22, %26 : vector<8x128xf32>
    %28 = vector.broadcast %2 : f32 to vector<8x128xf32>
    %29 = arith.cmpf olt, %18, %28 : vector<8x128xf32>
    %30 = arith.extui %29 : vector<8x128xi1> to vector<8x128xi32>
    %31 = arith.sitofp %30 : vector<8x128xi32> to vector<8x128xf32>
    %32 = arith.addf %27, %31 : vector<8x128xf32>
    %cst_8 = arith.constant 3.906250e-03 : f32
    %33 = vector.broadcast %cst_8 : f32 to vector<8x128xf32>
    %34 = arith.mulf %32, %33 : vector<8x128xf32>
    %c0_9 = arith.constant 0 : index
    %c0_10 = arith.constant 0 : index
    %35 = vector.load %arg4[%c0_9, %c0_10] : memref<8x128xf32, #tpu.memory_space<vmem>>, vector<8x128xf32>
    tpu.vector_store %arg4[%c0_9, %c0_10], %34 {strides = array<i32>} : memref<8x128xf32, #tpu.memory_space<vmem>>, vector<8x128xf32>,
    return
  }
  func.func @transform_0(%arg0: i32) -> i32 {
    %c0_i32 = arith.constant 0 : i32
    %c0_i32_0 = arith.constant 0 : i32
    return %c0_i32 : i32
  }
  func.func @transform_1(%arg0: i32) -> (i32, i32) {
    %c0_i32 = arith.constant 0 : i32
    %c0_i32_0 = arith.constant 0 : i32
    return %arg0, %c0_i32 : i32, i32
  }
  func.func @transform_2(%arg0: i32) -> (i32, i32) {
    %c0_i32 = arith.constant 0 : i32
    %c0_i32_0 = arith.constant 0 : i32
    return %arg0, %c0_i32 : i32, i32
  }
  func.func @transform_3(%arg0: i32) -> (i32, i32) {
    %c0_i32 = arith.constant 0 : i32
    %c0_i32_0 = arith.constant 0 : i32
    return %arg0, %c0_i32 : i32, i32
  }
}

</mosaic_0001>

<bundles_post_ra>
// kernel: tpu_custom_call.1
= control target key start
LH: loop header
LB: loop body
LE: loop exit
PB: predicated region body
PF: predicated region fallthrough
CT: control target
= control target key end

     0   :  { %8 = vsyncpa [#allocation5], 0  ;;  %s282_s0 = inlined_call_operand.hbm [shape: f32[3], index: 0, kind: input, shape index: {}]   ;;  %s283_s1 = inlined_call_operand.hbm [shape: f32[8,128], index: 1, kind: input, shape index: {}]   ;;  %s284_s2 = inlined_call_operand.hbm [shape: f32[8,128], index: 2, kind: input, shape index: {}]   ;;  %s285_s3 = inlined_call_operand.hbm [shape: f32[8,128], index: 3, kind: output, shape index: {}]  }
   0x1   :  { %9 = vsyncpa [#allocation3], 0 }
   0x2   :  { %10 = vsyncpa [#allocation8], 0 }
   0x3   :  { %11 = vsyncpa [#allocation4], 0  ;;  %s17_s14 = sshll.u32 %s282_s0, 4  ;;  %s26_s17 = sshll.u32 %s283_s1, 4  ;;  %s18_s14 = int_to_ptr.hbm [resolvable:$true] %s17_s14  ;;  %s27_s17 = int_to_ptr.hbm [resolvable:$true] %s26_s17 }
   0x4   :  { %s239_s18 = smov [#allocation2]   ;;  %s240_s19 = smov [#allocation6]  }
   0x5   :  { %20 = dma.hbm_to_smem %s18_s14, 16, %s239_s18, [#allocation5]  }
   0x6   :  { %s28_s20 = sshll.u32 %s240_s19, 4  ;;  %s37_s23 = sshll.u32 %s284_s2, 4  ;;  %s29_s20 = int_to_ptr.vmem [resolvable:$true] %s28_s20  ;;  %s38_s23 = int_to_ptr.hbm [resolvable:$true] %s37_s23 }
   0x7   :  { %31 = dma.hbm_to_vmem [thread:$0]  %s27_s17, 128, %s29_s20, [#allocation3]  }
   0x8   :  { %s241_s24 = smov [#allocation7]  }
   0x9   :  { %s39_s25 = sshll.u32 %s241_s24, 4  ;;  %s40_s25 = int_to_ptr.vmem [resolvable:$true] %s39_s25 }
   0xa   :  { %42 = dma.hbm_to_vmem [thread:$0]  %s38_s23, 128, %s40_s25, [#allocation8]  }
   0xb   :  { %231 = dma.done.wait [#allocation5], 16  }
   0xc   :  { %232 = vsyncadd [#allocation5], 4294967280 }
   0xd   :  { %233 = dma.done.wait [#allocation3], 128  }
   0xe   :  { %234 = vsyncadd [#allocation3], 4294967168 }
   0xf   :  { %235 = dma.done.wait [#allocation8], 128  }
  0x10   :  { %236 = vsyncadd [#allocation8], 4294967168 }
  0x11   :  { %55 = sfence }
  0x12   :  { %v59_v0 = vld [vmem:[#allocation6] sm:$0xff]  ;;  %v60_v1 = vld [vmem:[#allocation7] sm:$0xff]  ;;  %s56_s0 = sld [smem:[#allocation2]]  ;;  %v242_v32 = vmov 0.0   ;;  %s243_s26 = smov [#allocation9]  }
  0x13   :  { %143 = vrcp.f32 %v60_v1  ;;  %vm66_vm0 = vweird.f32 %v60_v1  ;;  %v87_v7 = vand.u32 2147483648, %v59_v0  ;;  %vm81_vm2 = vweird.f32 %v59_v0  ;;  %s133_s1 = sld [smem:[#allocation2 + $0x1]]  ;;  %s119_s27 = sshll.u32 %s243_s26, 4  ;;  %s120_s27 = int_to_ptr.vmem [resolvable:$true] %s119_s27 }
  0x14   :  { %145 = vrcp.f32 %v59_v0  ;;  %v85_v9 = vand.u32 2147483647, %v59_v0  ;;  %v72_v11 = vand.u32 2147483648, %v60_v1  ;;  %v70_v13 = vand.u32 2147483647, %v60_v1  ;;  %s134_s2 = sld [smem:[#allocation2 + $0x2]] }
  0x15   :  { %v88_v16 = vor.u32 1.1754944e-38, %v87_v7  ;;  %s121_s30 = sshll.u32 %s285_s3, 4  ;;  %s122_s30 = int_to_ptr.hbm [resolvable:$true] %s121_s30 }
  0x16   :  { %vm86_vm6 = vcmp.eq.f32.partialorder %v85_v9, 8.507059e+37  ;;  %v73_v18 = vor.u32 1.1754944e-38, %v72_v11  ;;  %vm71_vm7 = vcmp.eq.f32.partialorder %v70_v13, 8.507059e+37 }
  0x18   :  { %v98_v28 = vstv %s56_s0 }
  0x19   :  { %v144_v2 = vpop.eup %143  ;;  %v102_v29 = vstv %s133_s1 }
  0x1a   :  { %v146_v3 = vpop.eup %145  ;;  %v62_v4 = vmul.f32 %v144_v2, %v60_v1  ;;  %vm67_vm1 = vweird.f32 %v144_v2  ;;  %v107_v30 = vstv %s134_s2 }
  0x1b   :  { %v77_v5 = vmul.f32 %v146_v3, %v59_v0  ;;  %vm82_vm3 = vweird.f32 %v146_v3  ;;  %vm273_vm4 = vmor %vm66_vm0, %vm67_vm1 }
  0x1c   :  { %v63_v6 = vsub.f32 1.0, %v62_v4  ;;  %vm83_vm5 = vmor %vm81_vm2, %vm82_vm3 }
  0x1d   :  { %v78_v8 = vsub.f32 1.0, %v77_v5 }
  0x1e   :  { %v64_v10 = vmul.f32 %v144_v2, %v63_v6 }
  0x1f   :  { %v79_v14 = vmul.f32 %v146_v3, %v78_v8 }
  0x20   :  { %v65_v15 = vadd.f32 %v144_v2, %v64_v10 }
  0x21   :  { %v80_v17 = vadd.f32 %v146_v3, %v79_v14 }
  0x22   :  { %v69_v19 = vsel %vm273_vm4, %v144_v2, %v65_v15 }
  0x23   :  { %v84_v20 = vsel %vm83_vm5, %v146_v3, %v80_v17  ;;  %v74_v23 = vsel %vm71_vm7, %v73_v18, %v69_v19 }
  0x24   :  { %v89_v21 = vsel %vm86_vm6, %v88_v16, %v84_v20  ;;  %v75_v25 = vmul.f32 %v74_v23, %v59_v0 }
  0x25   :  { %v90_v22 = vmul.f32 %v89_v21, %v60_v1 }
  0x27   :  { %vm91_vm8 = vcmp.ne.f32.partialorder %v90_v22, %v90_v22 }
  0x28   :  { %v92_v24 = vsel %vm91_vm8, 0.0, %v90_v22 }
  0x29   :  { %vm93_vm9 = vcmp.eq.f32.partialorder %v92_v24, inf }
  0x2a   :  { %v94_v26 = vsel %vm93_vm9, 1.0, %v92_v24 }
  0x2b   :  { %vm95_vm10 = vcmp.eq.f32.partialorder %v94_v26, -inf }
  0x2c   :  { %v96_v27 = vsel %vm95_vm10, -3.4028235e+38, %v94_v26 }
  0x2d   :  { %v97_v31 = vmax.f32 %v75_v25, %v96_v27 }
  0x2f   :  { %vm99_vm11 = vcmp.lt.f32.partialorder %v97_v31, %v98_v28  ;;  %vm103_vm12 = vcmp.lt.f32.partialorder %v97_v31, %v102_v29  ;;  %vm108_vm13 = vcmp.lt.f32.partialorder %v97_v31, %v107_v30 }
  0x30   :  { %v135_v33 = vsel %vm99_vm11, 1.0, %v242_v32  ;;  %v136_v34 = vsel %vm103_vm12, 1.0, %v242_v32  ;;  %v137_v35 = vsel %vm108_vm13, 1.0, %v242_v32 }
  0x31   :  { %v106_v36 = vadd.f32 %v136_v34, %v135_v33 }
  0x33   :  { %v111_v37 = vadd.f32 %v137_v35, %v106_v36 }
  0x35   :  { %v112_v38 = vmul.f32 0.00390625, %v111_v37 }
  0x37   :  { %113 = vst [vmem:[#allocation9] sm:$0xff] %v112_v38 }
  0x38   :  { %124 = dma.vmem_to_hbm [thread:$0]  %s120_s27, 128, %s122_s30, [#allocation4]  }
  0x39   :  { %237 = dma.done.wait [#allocation4], 128  }
  0x3a   :  { %238 = vsyncadd [#allocation4], 4294967168 }
  0x3b   :  { %129 = vsyncpa [#allocation3], 1 }
  0x3c   :  { %130 = vsyncpa [#allocation8], 1 }
  0x3d   :  { %131 = vsyncpa [#allocation4], 1 }
  0x3e   :  { %132 = vsyncpa [#allocation5], 1 }

</bundles_post_ra>
